<compile_context>
chip_gen: v7x
topology: tpu7x:2x2x1
jax: 0.10.0
libtpu: 0.0.40
codegen_flags: <defaults>
</compile_context>

<pallas_src>
import math
import functools

import jax
import jax.numpy as jnp
from jax import lax
from jax.experimental import pallas as pl
from jax.experimental.pallas import tpu as pltpu

_LN_EPS = 1e-5


def _round_up(a, m):
    return (a + m - 1) // m * m


def _has_bf16_vpu():
    """v6e/v7x have native bf16 VPU; v5e and older do not."""
    try:
        kind = jax.devices()[0].device_kind.lower()
    except Exception:
        return False
    return ("v6" in kind) or ("v7" in kind)


def _mlp_kernel(x_ref, t_ref, freq_ref,
                w_in_ref, w_t_ref, b_fused_ref,
                w_blk_ref, b_blk_ref, g_blk_ref, beta_blk_ref,
                w_out_ref, b_out_ref,
                o_ref,
                *, layers, vpu_in_proj, bf16_elem):
    f32 = jnp.float32
    bf16 = jnp.bfloat16

    x = x_ref[...]                                            # (TB, cd) f32

    # ---- in_projection (bias folded into b_fused) ----
    if vpu_in_proj:
        # K == channels_data is tiny (<=8): broadcast FMAs on the VPU instead
        # of an MXU pass that would use <=8 of its input rows.
        cd = x.shape[1]
        h = x[:, 0:1] * w_in_ref[0:1, :]
        for k in range(1, cd):
            h = h + x[:, k:k + 1] * w_in_ref[k:k + 1, :]
    else:
        h = jnp.dot(x.astype(bf16), w_in_ref[...], preferred_element_type=f32)

    # ---- sinusoidal time embedding + t_projection (single K=channels_t dot) --
    # freq_ref already has the max_t scale folded in: arg = (t*max_t) * freqs.
    arg = t_ref[...] * freq_ref[...]                          # (TB, half) f32
    emb = jnp.concatenate([jnp.sin(arg), jnp.cos(arg)], axis=-1).astype(bf16)
    t_emb = jnp.dot(emb, w_t_ref[...], preferred_element_type=f32)

    h = h + t_emb + b_fused_ref[...]                          # (TB, C) f32
    if bf16_elem:
        h = h.astype(bf16)

    # ---- blocks: Linear -> LayerNorm(eps=1e-5) -> ReLU ----
    # TODO(synk): for very large layers*channels^2 (approaching ~half of v7x's
    # 64 MiB VMEM), stream w_blk per layer instead of keeping it resident.
    def layer_body(l, h_in):
        y = (jnp.dot(h_in.astype(bf16), w_blk_ref[l],
                     preferred_element_type=f32) + b_blk_ref[l])   # (TB, C) f32
        # Independent XLU reductions; stats stay f32.
        mu = jnp.mean(y, axis=-1, keepdims=True)
        msq = jnp.mean(y * y, axis=-1, keepdims=True)
        inv = lax.rsqrt(jnp.maximum(msq - mu * mu, 0.0) + _LN_EPS)
        if bf16_elem:
            yn = (y - mu).astype(bf16) * inv.astype(bf16)
            yn = yn * g_blk_ref[l].astype(bf16) + beta_blk_ref[l].astype(bf16)
            return jnp.maximum(yn, 0.0)
        yn = (y - mu) * inv
        yn = yn * g_blk_ref[l] + beta_blk_ref[l]
        return jnp.maximum(yn, 0.0)

    if layers <= 4:
        for l in range(layers):
            h = layer_body(l, h)
    else:
        # Bound the live vreg/VMEM set at one layer's worth.
        h = lax.fori_loop(0, layers, layer_body, h)

    # ---- out_projection: padded to >=128 output lanes -> unmasked stores ----
    o_ref[...] = (jnp.dot(h.astype(bf16), w_out_ref[...],
                          preferred_element_type=f32)
                  + b_out_ref[...]).astype(o_ref.dtype)


def prepare_params(params, *, max_t=10000):
    """One-time parameter prep: transposes, bias fold, freq table, bf16 cast.

    Run ONCE outside the per-call path.  Note on odd channels_t: the PyTorch
    module zero-pads the embedding by one column, so that weight column
    contributes nothing; using only the first 2*(channels_t//2) columns of w_t
    is exactly equivalent.
    """
    bf16 = jnp.bfloat16
    w_in = params["w_in"]                      # (C, cd)
    w_t = params["w_t"]                        # (C, channels_t)
    w_out = params["w_out"]                    # (cd, C)
    C, cd = w_in.shape
    channels_t = w_t.shape[1]
    half = channels_t // 2

    # Sinusoidal frequency row with max_t folded in.
    denom = (half - 1) if half > 1 else 1
    freqs = jnp.exp(-(math.log(max_t) / denom)
                    * jnp.arange(half, dtype=jnp.float32))
    freqs = (float(max_t) * freqs)[None, :]                  # (1, half)

    # Lane-dense out projection: pad N=cd up to >=128 so the store is unmasked.
    cd_pad = max(128, _round_up(cd, 128))
    w_out_p = jnp.zeros((C, cd_pad), jnp.float32).at[:, :cd].set(w_out.T)
    b_out_p = jnp.zeros((1, cd_pad), jnp.float32).at[0, :cd].set(params["b_out"])

    vpu_in_proj = cd <= 8
    return {
        "freqs": freqs,
        "w_in": jnp.asarray(w_in.T, jnp.float32 if vpu_in_proj else bf16),   # (cd, C)
        "w_t": jnp.asarray(w_t[:, :2 * half].T, bf16),                       # (2*half, C)
        "b_fused": (params["b_in"] + params["b_t"])[None, :].astype(jnp.float32),
        "w_blk": jnp.transpose(params["w_blk"], (0, 2, 1)).astype(bf16),     # (L, C, C)
        "b_blk": params["b_blk"][:, None, :].astype(jnp.float32),            # (L, 1, C)
        "g_blk": params["g_blk"][:, None, :].astype(jnp.float32),
        "beta_blk": params["beta_blk"][:, None, :].astype(jnp.float32),
        "w_out": w_out_p.astype(bf16),                                       # (C, cd_pad)
        "b_out": b_out_p,                                                    # (1, cd_pad)
    }


def mlp_forward(x, t, prepped, *, layers, block_b=2048):
    """x: (B, channels_data) f32, t: (B,) f32 -> (B, channels_data) f32."""
    B, cd = x.shape
    C = prepped["b_fused"].shape[1]
    half = prepped["freqs"].shape[1]
    cd_pad = prepped["w_out"].shape[1]
    channels_t_eff = 2 * half

    x = x.astype(jnp.float32)
    t2d = t.reshape(B, 1).astype(jnp.float32)

    # Large batch tile (amortize ~0.35us grid-step overhead), multiple of 8
    # rows; keep >=2 grid steps when B allows so ("parallel",) can shard the
    # batch across v7x's two TensorCores.
    tb = min(block_b, _round_up(B, 8))
    if B > 8 and _round_up(B, tb) // tb < 2:
        tb = max(8, _round_up(pl.cdiv(B, 2), 8))
    b_pad = _round_up(B, tb)
    if b_pad != B:
        x = jnp.pad(x, ((0, b_pad - B), (0, 0)))
        t2d = jnp.pad(t2d, ((0, b_pad - B), (0, 0)))
    grid = (b_pad // tb,)

    vpu_in_proj = cd <= 8
    bf16_elem = _has_bf16_vpu()
    kernel = functools.partial(_mlp_kernel, layers=layers,
                               vpu_in_proj=vpu_in_proj, bf16_elem=bf16_elem)

    # Weights: constant index_map -> fetched once, VMEM-resident across grid.
    c2 = lambda i: (0, 0)
    c3 = lambda i: (0, 0, 0)
    in_specs = [
        pl.BlockSpec((tb, cd), lambda i: (i, 0)),     # x   (tiled over batch)
        pl.BlockSpec((tb, 1), lambda i: (i, 0)),      # t
        pl.BlockSpec(prepped["freqs"].shape, c2),
        pl.BlockSpec(prepped["w_in"].shape, c2),
        pl.BlockSpec(prepped["w_t"].shape, c2),
        pl.BlockSpec(prepped["b_fused"].shape, c2),
        pl.BlockSpec(prepped["w_blk"].shape, c3),
        pl.BlockSpec(prepped["b_blk"].shape, c3),
        pl.BlockSpec(prepped["g_blk"].shape, c3),
        pl.BlockSpec(prepped["beta_blk"].shape, c3),
        pl.BlockSpec(prepped["w_out"].shape, c2),
        pl.BlockSpec(prepped["b_out"].shape, c2),
    ]
    out_specs = pl.BlockSpec((tb, cd_pad), lambda i: (i, 0))

    # Advisory cost estimate for XLA's scheduler.
    weight_bytes = sum(int(v.size) * v.dtype.itemsize for v in prepped.values())
    flops = int(2 * b_pad * C * (layers * C + channels_t_eff + cd + cd_pad))
    transcendentals = int(b_pad * (channels_t_eff + layers))     # sin/cos + rsqrt
    bytes_accessed = int(weight_bytes + (x.size + t2d.size + b_pad * cd_pad) * 4)
    ce = pl.CostEstimate(flops=flops, transcendentals=transcendentals,
                         bytes_accessed=bytes_accessed)

    # Scoped-VMEM budget: resident weights + double-buffered tiles + per-layer
    # intermediates + slack; defaults are only 16/32 MiB.  Cap at 64 MiB (v7x
    # physical limit) which is ample for these sizes.
    tile_bytes = 2 * 4 * (tb * cd + tb + tb * cd_pad)
    act_bytes = 8 * tb * C * 4
    vmem_limit = int(max(32 << 20,
                         min(weight_bytes + tile_bytes + act_bytes + (4 << 20),
                             64 << 20)))

    out = pl.pallas_call(
        kernel,
        out_shape=jax.ShapeDtypeStruct((b_pad, cd_pad), jnp.float32),
        grid_spec=pltpu.PrefetchScalarGridSpec(
            num_scalar_prefetch=0,
            grid=grid,
            in_specs=in_specs,
            out_specs=out_specs,
        ),
        compiler_params=pltpu.CompilerParams(
            dimension_semantics=("parallel",),      # v7x: shard batch over 2 TCs
            vmem_limit_bytes=vmem_limit),
        cost_estimate=ce,
    )(x, t2d, prepped["freqs"],
      prepped["w_in"], prepped["w_t"], prepped["b_fused"],
      prepped["w_blk"], prepped["b_blk"], prepped["g_blk"], prepped["beta_blk"],
      prepped["w_out"], prepped["b_out"])

    return out[:B, :cd]


def init_params(key, channels_data, channels, channels_t, layers):
    ks = jax.random.split(key, 8)
    s = 0.05
    return {
        "w_in": s * jax.random.normal(ks[0], (channels, channels_data), jnp.float32),
        "b_in": s * jax.random.normal(ks[1], (channels,), jnp.float32),
        "w_t": s * jax.random.normal(ks[2], (channels, channels_t), jnp.float32),
        "b_t": s * jax.random.normal(ks[3], (channels,), jnp.float32),
        "w_blk": s * jax.random.normal(ks[4], (layers, channels, channels), jnp.float32),
        "b_blk": s * jax.random.normal(ks[5], (layers, channels), jnp.float32),
        "g_blk": jnp.ones((layers, channels), jnp.float32),
        "beta_blk": jnp.zeros((layers, channels), jnp.float32),
        "w_out": s * jax.random.normal(ks[6], (channels_data, channels), jnp.float32),
        "b_out": s * jax.random.normal(ks[7], (channels_data,), jnp.float32),
    }


def mlp_reference(x, t, params, *, channels_t, layers, max_t=10000):
    """Pure-JAX f32 reference mirroring the PyTorch forward."""
    h = x @ params["w_in"].T + params["b_in"]
    tt = t * max_t
    half = channels_t // 2
    denom = (half - 1) if half > 1 else 1
    emb = jnp.exp(-(math.log(max_t) / denom) * jnp.arange(half, dtype=jnp.float32))
    emb = tt[:, None] * emb[None, :]
    emb = jnp.concatenate([jnp.sin(emb), jnp.cos(emb)], axis=1)
    temb = emb @ params["w_t"][:, :2 * half].T + params["b_t"]
    h = h + temb
    for l in range(layers):
        y = h @ params["w_blk"][l].T + params["b_blk"][l]
        mu = jnp.mean(y, axis=-1, keepdims=True)
        var = jnp.mean((y - mu) ** 2, axis=-1, keepdims=True)
        yn = (y - mu) / jnp.sqrt(var + _LN_EPS)
        yn = yn * params["g_blk"][l] + params["beta_blk"][l]
        h = jnp.maximum(yn, 0.0)
    return h @ params["w_out"].T + params["b_out"]


def _run_case(B, channels_data, channels, channels_t, layers, seed):
    key = jax.random.PRNGKey(seed)
    kx, kt, kp = jax.random.split(key, 3)
    x = jax.random.normal(kx, (B, channels_data), jnp.float32)
    t = jax.random.uniform(kt, (B,), jnp.float32)
    params = init_params(kp, channels_data, channels, channels_t, layers)

    prepped = prepare_params(params)            # one-time weight prep
    out = mlp_forward(x, t, prepped, layers=layers)
    out = jax.block_until_ready(out)

    ref = mlp_reference(x, t, params, channels_t=channels_t, layers=layers)
    assert out.shape == (B, channels_data)
    max_err = float(jnp.max(jnp.abs(out - ref)))
    assert max_err < 5e-2, f"mismatch vs reference: max abs err {max_err}"


if __name__ == "__main__":
    # Small shapes consistent with the module (channels_data=2).
    # Case 1: unrolled layer path, single grid step.
    _run_case(B=8, channels_data=2, channels=128, channels_t=128, layers=3, seed=0)
    # Case 2: fori_loop layer path, multi-tile grid (exercises batch tiling).
    _run_case(B=24, channels_data=2, channels=128, channels_t=64, layers=6, seed=1)
    print("KERNEL_OK")
</pallas_src>

<mosaic_0001>
module attributes {stable_mosaic.version = 11 : i64} {
  func.func @_mlp_kernel(%arg0: i32, %arg1: memref<8x2xf32, #tpu.memory_space<vmem>>, %arg2: memref<8x1xf32, #tpu.memory_space<vmem>>, %arg3: memref<1x64xf32, #tpu.memory_space<vmem>>, %arg4: memref<2x128xf32, #tpu.memory_space<vmem>>, %arg5: memref<128x128xbf16, #tpu.memory_space<vmem>>, %arg6: memref<1x128xf32, #tpu.memory_space<vmem>>, %arg7: memref<3x128x128xbf16, #tpu.memory_space<vmem>>, %arg8: memref<3x1x128xf32, #tpu.memory_space<vmem>>, %arg9: memref<3x1x128xf32, #tpu.memory_space<vmem>>, %arg10: memref<3x1x128xf32, #tpu.memory_space<vmem>>, %arg11: memref<128x128xbf16, #tpu.memory_space<vmem>>, %arg12: memref<1x128xf32, #tpu.memory_space<vmem>>, %arg13: memref<8x128xf32, #tpu.memory_space<vmem>>) attributes {dimension_semantics = [#tpu.dimension_semantics<parallel>], iteration_bounds = array<i64: 1>, scalar_prefetch = 0 : i64, scratch_operands = 0 : i64, tpu.core_type = #tpu.core_type<tc>, window_params = [{transform_indices = @transform_0, window_bounds = array<i64: 8, 2>}, {transform_indices = @transform_1, window_bounds = array<i64: 8, 1>}, {pipeline_mode = #tpu.pipeline_mode<synchronous>, transform_indices = @transform_2, window_bounds = array<i64: 1, 64>}, {pipeline_mode = #tpu.pipeline_mode<synchronous>, transform_indices = @transform_3, window_bounds = array<i64: 2, 128>}, {pipeline_mode = #tpu.pipeline_mode<synchronous>, transform_indices = @transform_4, window_bounds = array<i64: 128, 128>}, {pipeline_mode = #tpu.pipeline_mode<synchronous>, transform_indices = @transform_5, window_bounds = array<i64: 1, 128>}, {pipeline_mode = #tpu.pipeline_mode<synchronous>, transform_indices = @transform_6, window_bounds = array<i64: 3, 128, 128>}, {pipeline_mode = #tpu.pipeline_mode<synchronous>, transform_indices = @transform_7, window_bounds = array<i64: 3, 1, 128>}, {pipeline_mode = #tpu.pipeline_mode<synchronous>, transform_indices = @transform_8, window_bounds = array<i64: 3, 1, 128>}, {pipeline_mode = #tpu.pipeline_mode<synchronous>, transform_indices = @transform_9, window_bounds = array<i64: 3, 1, 128>}, {pipeline_mode = #tpu.pipeline_mode<synchronous>, transform_indices = @transform_10, window_bounds = array<i64: 128, 128>}, {pipeline_mode = #tpu.pipeline_mode<synchronous>, transform_indices = @transform_11, window_bounds = array<i64: 1, 128>}, {transform_indices = @transform_12, window_bounds = array<i64: 8, 128>}]} {
    %c0 = arith.constant 0 : index
    %c0_0 = arith.constant 0 : index
    %0 = vector.load %arg1[%c0, %c0_0] : memref<8x2xf32, #tpu.memory_space<vmem>>, vector<8x2xf32>
    %1 = vector.extract_strided_slice %0 {offsets = [0, 0], sizes = [8, 1], strides = [1, 1]} : vector<8x2xf32> to vector<8x1xf32>
    %c0_1 = arith.constant 0 : index
    %c0_2 = arith.constant 0 : index
    %2 = vector.load %arg4[%c0_1, %c0_2] : memref<2x128xf32, #tpu.memory_space<vmem>>, vector<1x128xf32>
    %3 = vector.broadcast %1 : vector<8x1xf32> to vector<8x128xf32>
    %4 = vector.broadcast %2 : vector<1x128xf32> to vector<8x128xf32>
    %5 = arith.mulf %3, %4 : vector<8x128xf32>
    %6 = vector.extract_strided_slice %0 {offsets = [0, 1], sizes = [8, 1], strides = [1, 1]} : vector<8x2xf32> to vector<8x1xf32>
    %c1 = arith.constant 1 : index
    %c0_3 = arith.constant 0 : index
    %7 = vector.load %arg4[%c1, %c0_3] : memref<2x128xf32, #tpu.memory_space<vmem>>, vector<1x128xf32>
    %8 = vector.broadcast %6 : vector<8x1xf32> to vector<8x128xf32>
    %9 = vector.broadcast %7 : vector<1x128xf32> to vector<8x128xf32>
    %10 = arith.mulf %8, %9 : vector<8x128xf32>
    %11 = arith.addf %5, %10 : vector<8x128xf32>
    %c0_4 = arith.constant 0 : index
    %c0_5 = arith.constant 0 : index
    %12 = vector.load %arg2[%c0_4, %c0_5] : memref<8x1xf32, #tpu.memory_space<vmem>>, vector<8x1xf32>
    %c0_6 = arith.constant 0 : index
    %c0_7 = arith.constant 0 : index
    %13 = vector.load %arg3[%c0_6, %c0_7] : memref<1x64xf32, #tpu.memory_space<vmem>>, vector<1x64xf32>
    %14 = vector.broadcast %12 : vector<8x1xf32> to vector<8x64xf32>
    %15 = vector.broadcast %13 : vector<1x64xf32> to vector<8x64xf32>
    %16 = arith.mulf %14, %15 : vector<8x64xf32>
    %17 = math.sin %16 : vector<8x64xf32>
    %18 = math.cos %16 : vector<8x64xf32>
    %19 = tpu.concatenate %17, %18 in 1 : vector<8x64xf32>, vector<8x64xf32> -> vector<8x128xf32>
    %20 = arith.truncf %19 : vector<8x128xf32> to vector<8x128xbf16>
    %c0_8 = arith.constant 0 : index
    %c0_9 = arith.constant 0 : index
    %21 = vector.load %arg5[%c0_8, %c0_9] : memref<128x128xbf16, #tpu.memory_space<vmem>>, vector<128x128xbf16>
    %cst = arith.constant dense<0.000000e+00> : vector<8x128xf32>
    %22 = tpu.matmul %20, %21, %cst {dimension_numbers = #tpu.dot_dimension_numbers<[1], [0], [0], [1], [0, 0, 1, 1], [], []>} : vector<8x128xbf16>, vector<128x128xbf16>, vector<8x128xf32> -> vector<8x128xf32>
    %23 = arith.addf %11, %22 : vector<8x128xf32>
    %c0_10 = arith.constant 0 : index
    %c0_11 = arith.constant 0 : index
    %24 = vector.load %arg6[%c0_10, %c0_11] : memref<1x128xf32, #tpu.memory_space<vmem>>, vector<1x128xf32>
    %25 = vector.broadcast %24 : vector<1x128xf32> to vector<8x128xf32>
    %26 = arith.addf %23, %25 : vector<8x128xf32>
    %27 = arith.truncf %26 : vector<8x128xf32> to vector<8x128xbf16>
    %c0_12 = arith.constant 0 : index
    %c0_13 = arith.constant 0 : index
    %c0_14 = arith.constant 0 : index
    %28 = vector.load %arg7[%c0_12, %c0_13, %c0_14] : memref<3x128x128xbf16, #tpu.memory_space<vmem>>, vector<1x128x128xbf16>
    %29 = vector.shape_cast %28 : vector<1x128x128xbf16> to vector<128x128xbf16>
    %cst_15 = arith.constant dense<0.000000e+00> : vector<8x128xf32>
    %30 = tpu.matmul %27, %29, %cst_15 {dimension_numbers = #tpu.dot_dimension_numbers<[1], [0], [0], [1], [0, 0, 1, 1], [], []>} : vector<8x128xbf16>, vector<128x128xbf16>, vector<8x128xf32> -> vector<8x128xf32>
    %c0_16 = arith.constant 0 : index
    %c0_17 = arith.constant 0 : index
    %c0_18 = arith.constant 0 : index
    %31 = vector.load %arg8[%c0_16, %c0_17, %c0_18] : memref<3x1x128xf32, #tpu.memory_space<vmem>>, vector<1x1x128xf32>
    %32 = vector.shape_cast %31 : vector<1x1x128xf32> to vector<1x128xf32>
    %33 = vector.broadcast %32 : vector<1x128xf32> to vector<8x128xf32>
    %34 = arith.addf %30, %33 : vector<8x128xf32>
    %cst_19 = arith.constant dense<0.000000e+00> : vector<8xf32>
    %35 = vector.multi_reduction <add>, %34, %cst_19 [1] : vector<8x128xf32> to vector<8xf32>
    %36 = vector.shape_cast %35 : vector<8xf32> to vector<8x1xf32>
    %cst_20 = arith.constant 1.280000e+02 : f32
    %37 = vector.broadcast %cst_20 : f32 to vector<8x1xf32>
    %38 = arith.divf %36, %37 : vector<8x1xf32>
    %39 = arith.mulf %34, %34 : vector<8x128xf32>
    %cst_21 = arith.constant dense<0.000000e+00> : vector<8xf32>
    %40 = vector.multi_reduction <add>, %39, %cst_21 [1] : vector<8x128xf32> to vector<8xf32>
    %41 = vector.shape_cast %40 : vector<8xf32> to vector<8x1xf32>
    %cst_22 = arith.constant 1.280000e+02 : f32
    %42 = vector.broadcast %cst_22 : f32 to vector<8x1xf32>
    %43 = arith.divf %41, %42 : vector<8x1xf32>
    %44 = arith.mulf %38, %38 : vector<8x1xf32>
    %45 = arith.subf %43, %44 : vector<8x1xf32>
    %cst_23 = arith.constant 0.000000e+00 : f32
    %46 = vector.broadcast %cst_23 : f32 to vector<8x1xf32>
    %47 = arith.maximumf %45, %46 : vector<8x1xf32>
    %cst_24 = arith.constant 9.99999974E-6 : f32
    %48 = vector.broadcast %cst_24 : f32 to vector<8x1xf32>
    %49 = arith.addf %47, %48 : vector<8x1xf32>
    %50 = math.rsqrt %49 : vector<8x1xf32>
    %51 = vector.broadcast %38 : vector<8x1xf32> to vector<8x128xf32>
    %52 = arith.subf %34, %51 : vector<8x128xf32>
    %53 = vector.broadcast %50 : vector<8x1xf32> to vector<8x128xf32>
    %54 = arith.mulf %52, %53 : vector<8x128xf32>
    %c0_25 = arith.constant 0 : index
    %c0_26 = arith.constant 0 : index
    %c0_27 = arith.constant 0 : index
    %55 = vector.load %arg9[%c0_25, %c0_26, %c0_27] : memref<3x1x128xf32, #tpu.memory_space<vmem>>, vector<1x1x128xf32>
    %56 = vector.shape_cast %55 : vector<1x1x128xf32> to vector<1x128xf32>
    %57 = vector.broadcast %56 : vector<1x128xf32> to vector<8x128xf32>
    %58 = arith.mulf %54, %57 : vector<8x128xf32>
    %c0_28 = arith.constant 0 : index
    %c0_29 = arith.constant 0 : index
    %c0_30 = arith.constant 0 : index
    %59 = vector.load %arg10[%c0_28, %c0_29, %c0_30] : memref<3x1x128xf32, #tpu.memory_space<vmem>>, vector<1x1x128xf32>
    %60 = vector.shape_cast %59 : vector<1x1x128xf32> to vector<1x128xf32>
    %61 = vector.broadcast %60 : vector<1x128xf32> to vector<8x128xf32>
    %62 = arith.addf %58, %61 : vector<8x128xf32>
    %cst_31 = arith.constant 0.000000e+00 : f32
    %63 = vector.broadcast %cst_31 : f32 to vector<8x128xf32>
    %64 = arith.maximumf %62, %63 : vector<8x128xf32>
    %65 = arith.truncf %64 : vector<8x128xf32> to vector<8x128xbf16>
    %c1_32 = arith.constant 1 : index
    %c0_33 = arith.constant 0 : index
    %c0_34 = arith.constant 0 : index
    %66 = vector.load %arg7[%c1_32, %c0_33, %c0_34] : memref<3x128x128xbf16, #tpu.memory_space<vmem>>, vector<1x128x128xbf16>
    %67 = vector.shape_cast %66 : vector<1x128x128xbf16> to vector<128x128xbf16>
    %cst_35 = arith.constant dense<0.000000e+00> : vector<8x128xf32>
    %68 = tpu.matmul %65, %67, %cst_35 {dimension_numbers = #tpu.dot_dimension_numbers<[1], [0], [0], [1], [0, 0, 1, 1], [], []>} : vector<8x128xbf16>, vector<128x128xbf16>, vector<8x128xf32> -> vector<8x128xf32>
    %c1_36 = arith.constant 1 : index
    %c0_37 = arith.constant 0 : index
    %c0_38 = arith.constant 0 : index
    %69 = vector.load %arg8[%c1_36, %c0_37, %c0_38] : memref<3x1x128xf32, #tpu.memory_space<vmem>>, vector<1x1x128xf32>
    %70 = vector.shape_cast %69 : vector<1x1x128xf32> to vector<1x128xf32>
    %71 = vector.broadcast %70 : vector<1x128xf32> to vector<8x128xf32>
    %72 = arith.addf %68, %71 : vector<8x128xf32>
    %cst_39 = arith.constant dense<0.000000e+00> : vector<8xf32>
    %73 = vector.multi_reduction <add>, %72, %cst_39 [1] : vector<8x128xf32> to vector<8xf32>
    %74 = vector.shape_cast %73 : vector<8xf32> to vector<8x1xf32>
    %cst_40 = arith.constant 1.280000e+02 : f32
    %75 = vector.broadcast %cst_40 : f32 to vector<8x1xf32>
    %76 = arith.divf %74, %75 : vector<8x1xf32>
    %77 = arith.mulf %72, %72 : vector<8x128xf32>
    %cst_41 = arith.constant dense<0.000000e+00> : vector<8xf32>
    %78 = vector.multi_reduction <add>, %77, %cst_41 [1] : vector<8x128xf32> to vector<8xf32>
    %79 = vector.shape_cast %78 : vector<8xf32> to vector<8x1xf32>
    %cst_42 = arith.constant 1.280000e+02 : f32
    %80 = vector.broadcast %cst_42 : f32 to vector<8x1xf32>
    %81 = arith.divf %79, %80 : vector<8x1xf32>
    %82 = arith.mulf %76, %76 : vector<8x1xf32>
    %83 = arith.subf %81, %82 : vector<8x1xf32>
    %cst_43 = arith.constant 0.000000e+00 : f32
    %84 = vector.broadcast %cst_43 : f32 to vector<8x1xf32>
    %85 = arith.maximumf %83, %84 : vector<8x1xf32>
    %cst_44 = arith.constant 9.99999974E-6 : f32
    %86 = vector.broadcast %cst_44 : f32 to vector<8x1xf32>
    %87 = arith.addf %85, %86 : vector<8x1xf32>
    %88 = math.rsqrt %87 : vector<8x1xf32>
    %89 = vector.broadcast %76 : vector<8x1xf32> to vector<8x128xf32>
    %90 = arith.subf %72, %89 : vector<8x128xf32>
    %91 = vector.broadcast %88 : vector<8x1xf32> to vector<8x128xf32>
    %92 = arith.mulf %90, %91 : vector<8x128xf32>
    %c1_45 = arith.constant 1 : index
    %c0_46 = arith.constant 0 : index
    %c0_47 = arith.constant 0 : index
    %93 = vector.load %arg9[%c1_45, %c0_46, %c0_47] : memref<3x1x128xf32, #tpu.memory_space<vmem>>, vector<1x1x128xf32>
    %94 = vector.shape_cast %93 : vector<1x1x128xf32> to vector<1x128xf32>
    %95 = vector.broadcast %94 : vector<1x128xf32> to vector<8x128xf32>
    %96 = arith.mulf %92, %95 : vector<8x128xf32>
    %c1_48 = arith.constant 1 : index
    %c0_49 = arith.constant 0 : index
    %c0_50 = arith.constant 0 : index
    %97 = vector.load %arg10[%c1_48, %c0_49, %c0_50] : memref<3x1x128xf32, #tpu.memory_space<vmem>>, vector<1x1x128xf32>
    %98 = vector.shape_cast %97 : vector<1x1x128xf32> to vector<1x128xf32>
    %99 = vector.broadcast %98 : vector<1x128xf32> to vector<8x128xf32>
    %100 = arith.addf %96, %99 : vector<8x128xf32>
    %cst_51 = arith.constant 0.000000e+00 : f32
    %101 = vector.broadcast %cst_51 : f32 to vector<8x128xf32>
    %102 = arith.maximumf %100, %101 : vector<8x128xf32>
    %103 = arith.truncf %102 : vector<8x128xf32> to vector<8x128xbf16>
    %c2 = arith.constant 2 : index
    %c0_52 = arith.constant 0 : index
    %c0_53 = arith.constant 0 : index
    %104 = vector.load %arg7[%c2, %c0_52, %c0_53] : memref<3x128x128xbf16, #tpu.memory_space<vmem>>, vector<1x128x128xbf16>
    %105 = vector.shape_cast %104 : vector<1x128x128xbf16> to vector<128x128xbf16>
    %cst_54 = arith.constant dense<0.000000e+00> : vector<8x128xf32>
    %106 = tpu.matmul %103, %105, %cst_54 {dimension_numbers = #tpu.dot_dimension_numbers<[1], [0], [0], [1], [0, 0, 1, 1], [], []>} : vector<8x128xbf16>, vector<128x128xbf16>, vector<8x128xf32> -> vector<8x128xf32>
    %c2_55 = arith.constant 2 : index
    %c0_56 = arith.constant 0 : index
    %c0_57 = arith.constant 0 : index
    %107 = vector.load %arg8[%c2_55, %c0_56, %c0_57] : memref<3x1x128xf32, #tpu.memory_space<vmem>>, vector<1x1x128xf32>
    %108 = vector.shape_cast %107 : vector<1x1x128xf32> to vector<1x128xf32>
    %109 = vector.broadcast %108 : vector<1x128xf32> to vector<8x128xf32>
    %110 = arith.addf %106, %109 : vector<8x128xf32>
    %cst_58 = arith.constant dense<0.000000e+00> : vector<8xf32>
    %111 = vector.multi_reduction <add>, %110, %cst_58 [1] : vector<8x128xf32> to vector<8xf32>
    %112 = vector.shape_cast %111 : vector<8xf32> to vector<8x1xf32>
    %cst_59 = arith.constant 1.280000e+02 : f32
    %113 = vector.broadcast %cst_59 : f32 to vector<8x1xf32>
    %114 = arith.divf %112, %113 : vector<8x1xf32>
    %115 = arith.mulf %110, %110 : vector<8x128xf32>
    %cst_60 = arith.constant dense<0.000000e+00> : vector<8xf32>
    %116 = vector.multi_reduction <add>, %115, %cst_60 [1] : vector<8x128xf32> to vector<8xf32>
    %117 = vector.shape_cast %116 : vector<8xf32> to vector<8x1xf32>
    %cst_61 = arith.constant 1.280000e+02 : f32
    %118 = vector.broadcast %cst_61 : f32 to vector<8x1xf32>
    %119 = arith.divf %117, %118 : vector<8x1xf32>
    %120 = arith.mulf %114, %114 : vector<8x1xf32>
    %121 = arith.subf %119, %120 : vector<8x1xf32>
    %cst_62 = arith.constant 0.000000e+00 : f32
    %122 = vector.broadcast %cst_62 : f32 to vector<8x1xf32>
    %123 = arith.maximumf %121, %122 : vector<8x1xf32>
    %cst_63 = arith.constant 9.99999974E-6 : f32
    %124 = vector.broadcast %cst_63 : f32 to vector<8x1xf32>
    %125 = arith.addf %123, %124 : vector<8x1xf32>
    %126 = math.rsqrt %125 : vector<8x1xf32>
    %127 = vector.broadcast %114 : vector<8x1xf32> to vector<8x128xf32>
    %128 = arith.subf %110, %127 : vector<8x128xf32>
    %129 = vector.broadcast %126 : vector<8x1xf32> to vector<8x128xf32>
    %130 = arith.mulf %128, %129 : vector<8x128xf32>
    %c2_64 = arith.constant 2 : index
    %c0_65 = arith.constant 0 : index
    %c0_66 = arith.constant 0 : index
    %131 = vector.load %arg9[%c2_64, %c0_65, %c0_66] : memref<3x1x128xf32, #tpu.memory_space<vmem>>, vector<1x1x128xf32>
    %132 = vector.shape_cast %131 : vector<1x1x128xf32> to vector<1x128xf32>
    %133 = vector.broadcast %132 : vector<1x128xf32> to vector<8x128xf32>
    %134 = arith.mulf %130, %133 : vector<8x128xf32>
    %c2_67 = arith.constant 2 : index
    %c0_68 = arith.constant 0 : index
    %c0_69 = arith.constant 0 : index
    %135 = vector.load %arg10[%c2_67, %c0_68, %c0_69] : memref<3x1x128xf32, #tpu.memory_space<vmem>>, vector<1x1x128xf32>
    %136 = vector.shape_cast %135 : vector<1x1x128xf32> to vector<1x128xf32>
    %137 = vector.broadcast %136 : vector<1x128xf32> to vector<8x128xf32>
    %138 = arith.addf %134, %137 : vector<8x128xf32>
    %cst_70 = arith.constant 0.000000e+00 : f32
    %139 = vector.broadcast %cst_70 : f32 to vector<8x128xf32>
    %140 = arith.maximumf %138, %139 : vector<8x128xf32>
    %141 = arith.truncf %140 : vector<8x128xf32> to vector<8x128xbf16>
    %c0_71 = arith.constant 0 : index
    %c0_72 = arith.constant 0 : index
    %142 = vector.load %arg11[%c0_71, %c0_72] : memref<128x128xbf16, #tpu.memory_space<vmem>>, vector<128x128xbf16>
    %cst_73 = arith.constant dense<0.000000e+00> : vector<8x128xf32>
    %143 = tpu.matmul %141, %142, %cst_73 {dimension_numbers = #tpu.dot_dimension_numbers<[1], [0], [0], [1], [0, 0, 1, 1], [], []>} : vector<8x128xbf16>, vector<128x128xbf16>, vector<8x128xf32> -> vector<8x128xf32>
    %c0_74 = arith.constant 0 : index
    %c0_75 = arith.constant 0 : index
    %144 = vector.load %arg12[%c0_74, %c0_75] : memref<1x128xf32, #tpu.memory_space<vmem>>, vector<1x128xf32>
    %145 = vector.broadcast %144 : vector<1x128xf32> to vector<8x128xf32>
    %146 = arith.addf %143, %145 : vector<8x128xf32>
    %c0_76 = arith.constant 0 : index
    %c0_77 = arith.constant 0 : index
    %147 = vector.load %arg13[%c0_76, %c0_77] : memref<8x128xf32, #tpu.memory_space<vmem>>, vector<8x128xf32>
    tpu.vector_store %arg13[%c0_76, %c0_77], %146 {strides = array<i32>} : memref<8x128xf32, #tpu.memory_space<vmem>>, vector<8x128xf32>,
    return
  }
  func.func @transform_0(%arg0: i32) -> (i32, i32) {
    %c0_i32 = arith.constant 0 : i32
    %c0_i32_0 = arith.constant 0 : i32
    return %arg0, %c0_i32 : i32, i32
  }
  func.func @transform_1(%arg0: i32) -> (i32, i32) {
    %c0_i32 = arith.constant 0 : i32
    %c0_i32_0 = arith.constant 0 : i32
    return %arg0, %c0_i32 : i32, i32
  }
  func.func @transform_2(%arg0: i32) -> (i32, i32) {
    %c0_i32 = arith.constant 0 : i32
    %c0_i32_0 = arith.constant 0 : i32
    %c0_i32_1 = arith.constant 0 : i32
    return %c0_i32, %c0_i32_0 : i32, i32
  }
  func.func @transform_3(%arg0: i32) -> (i32, i32) {
    %c0_i32 = arith.constant 0 : i32
    %c0_i32_0 = arith.constant 0 : i32
    %c0_i32_1 = arith.constant 0 : i32
    return %c0_i32, %c0_i32_0 : i32, i32
  }
  func.func @transform_4(%arg0: i32) -> (i32, i32) {
    %c0_i32 = arith.constant 0 : i32
    %c0_i32_0 = arith.constant 0 : i32
    %c0_i32_1 = arith.constant 0 : i32
    return %c0_i32, %c0_i32_0 : i32, i32
  }
  func.func @transform_5(%arg0: i32) -> (i32, i32) {
    %c0_i32 = arith.constant 0 : i32
    %c0_i32_0 = arith.constant 0 : i32
    %c0_i32_1 = arith.constant 0 : i32
    return %c0_i32, %c0_i32_0 : i32, i32
  }
  func.func @transform_6(%arg0: i32) -> (i32, i32, i32) {
    %c0_i32 = arith.constant 0 : i32
    %c0_i32_0 = arith.constant 0 : i32
    %c0_i32_1 = arith.constant 0 : i32
    %c0_i32_2 = arith.constant 0 : i32
    return %c0_i32, %c0_i32_0, %c0_i32_1 : i32, i32, i32
  }
  func.func @transform_7(%arg0: i32) -> (i32, i32, i32) {
    %c0_i32 = arith.constant 0 : i32
    %c0_i32_0 = arith.constant 0 : i32
    %c0_i32_1 = arith.constant 0 : i32
    %c0_i32_2 = arith.constant 0 : i32
    return %c0_i32, %c0_i32_0, %c0_i32_1 : i32, i32, i32
  }
  func.func @transform_8(%arg0: i32) -> (i32, i32, i32) {
    %c0_i32 = arith.constant 0 : i32
    %c0_i32_0 = arith.constant 0 : i32
    %c0_i32_1 = arith.constant 0 : i32
    %c0_i32_2 = arith.constant 0 : i32
    return %c0_i32, %c0_i32_0, %c0_i32_1 : i32, i32, i32
  }
  func.func @transform_9(%arg0: i32) -> (i32, i32, i32) {
    %c0_i32 = arith.constant 0 : i32
    %c0_i32_0 = arith.constant 0 : i32
    %c0_i32_1 = arith.constant 0 : i32
    %c0_i32_2 = arith.constant 0 : i32
    return %c0_i32, %c0_i32_0, %c0_i32_1 : i32, i32, i32
  }
  func.func @transform_10(%arg0: i32) -> (i32, i32) {
    %c0_i32 = arith.constant 0 : i32
    %c0_i32_0 = arith.constant 0 : i32
    %c0_i32_1 = arith.constant 0 : i32
    return %c0_i32, %c0_i32_0 : i32, i32
  }
  func.func @transform_11(%arg0: i32) -> (i32, i32) {
    %c0_i32 = arith.constant 0 : i32
    %c0_i32_0 = arith.constant 0 : i32
    %c0_i32_1 = arith.constant 0 : i32
    return %c0_i32, %c0_i32_0 : i32, i32
  }
  func.func @transform_12(%arg0: i32) -> (i32, i32) {
    %c0_i32 = arith.constant 0 : i32
    %c0_i32_0 = arith.constant 0 : i32
    return %arg0, %c0_i32 : i32, i32
  }
}

</mosaic_0001>

<bundles_post_ra>
// kernel: tpu_custom_call.1
= control target key start
LH: loop header
LB: loop body
LE: loop exit
PB: predicated region body
PF: predicated region fallthrough
CT: control target
= control target key end

     0   :  { %17 = vsyncpa [#allocation3], 0  ;;  %s1660_s0 = inlined_call_operand.vmem [shape: f32[8,2], index: 0, kind: input, shape index: {}]   ;;  %s1661_s1 = inlined_call_operand.vmem [shape: f32[8,1], index: 1, kind: input, shape index: {}]   ;;  %s1662_s2 = inlined_call_operand.vmem [shape: f32[1,64], index: 2, kind: input, shape index: {}]   ;;  %s1663_s3 = inlined_call_operand.vmem [shape: f32[2,128], index: 3, kind: input, shape index: {}]   ;;  %s1664_s4 = inlined_call_operand.hbm [shape: bf16[128,128], index: 4, kind: input, shape index: {}]   ;;  %s1665_s5 = inlined_call_operand.vmem [shape: f32[1,128], index: 5, kind: input, shape index: {}]   ;;  %s1666_s6 = inlined_call_operand.hbm [shape: bf16[3,128,128], index: 6, kind: input, shape index: {}]   ;;  %s1667_s7 = inlined_call_operand.vmem [shape: f32[3,1,128], index: 7, kind: input, shape index: {}]   ;;  %s1668_s8 = inlined_call_operand.vmem [shape: f32[3,1,128], index: 8, kind: input, shape index: {}]   ;;  %s1669_s9 = inlined_call_operand.vmem [shape: f32[3,1,128], index: 9, kind: input, shape index: {}]   ;;  %s1670_s10 = inlined_call_operand.hbm [shape: bf16[128,128], index: 10, kind: input, shape index: {}]   ;;  %s1671_s11 = inlined_call_operand.vmem [shape: f32[1,128], index: 11, kind: input, shape index: {}]   ;;  %s1672_s12 = inlined_call_operand.hbm [shape: f32[8,128], index: 12, kind: output, shape index: {}]  }
   0x1   :  { %18 = vsyncpa [#allocation6], 0 }
   0x2   :  { %19 = vsyncpa [#allocation4], 0  ;;  %s1395_s21 = smov [#allocation5]   ;;  %s1396_s23 = smov [#allocation2]  }
   0x3   :  { %s47_s22 = sshll.u32 %s1395_s21, 4  ;;  %s33_s24 = sshll.u32 %s1396_s23, 4  ;;  %s48_s22 = int_to_ptr.vmem [resolvable:$true] %s47_s22  ;;  %s1476_s24 = int_to_ptr.vmem [resolvable:$true] %s33_s24 }
   0x4   :  { %s1301_s27 = scalar_lea.hbm %s1666_s6, 3072 }
   0x5   :  { %p1302_p0 = scmp.ne.s32.totalorder %s1666_s6, %s1301_s27  ;;  %p1305_p1 = scmp.lt.u32.totalorder %s1301_s27, %s1666_s6 }
   0x7   :  { %p1307_p2 = pnand %p1305_p1, %p1302_p0 }
   0x9   :  { %1310 = shalt.err (!%p1307_p2)
}
   0xa   :  { %s1311_s14 = scalar_lea.vmem %s48_s22, 3072  ;;  %p1316_p4 = scmp.lt.s32.totalorder %s48_s22, %s48_s22 }
   0xb   :  { %p1312_p3 = scmp.ne.s32.totalorder %s48_s22, %s1311_s14  ;;  %p1317_p5 = scmp.lt.s32.totalorder %s1311_s14, %s1311_s14 }
   0xd   :  { %p1318_p6 = por %p1317_p5, %p1316_p4 }
   0xf   :  { %p1319_p7 = pnand %p1318_p6, %p1312_p3 }
  0x11   :  { %1322 = shalt.err (!%p1319_p7)
}
  0x12   :  { %s1397_s15 = smov 64   ;;  %s1398_s16 = smov 4  }
  0x13   :  { %53 = dma.hbm_to_vmem [thread:$0]  %s1666_s6, 3072, %s48_s22, [#allocation6], %s1397_s15, %s1397_s15, %s1398_s16  }
  0x14   :  { %s1323_s21 = scalar_lea.hbm %s1664_s4, 1024 }
  0x15   :  { %p1324_p8 = scmp.ne.s32.totalorder %s1664_s4, %s1323_s21  ;;  %p1327_p9 = scmp.lt.u32.totalorder %s1323_s21, %s1664_s4 }
  0x17   :  { %p1329_p10 = pnand %p1327_p9, %p1324_p8 }
  0x19   :  { %1332 = shalt.err (!%p1329_p10)
}
  0x1a   :  { %s1333_s28 = scalar_lea.vmem %s1476_s24, 1024  ;;  %p1338_p12 = scmp.lt.s32.totalorder %s1476_s24, %s1476_s24 }
  0x1b   :  { %p1334_p11 = scmp.ne.s32.totalorder %s1476_s24, %s1333_s28  ;;  %p1339_p13 = scmp.lt.s32.totalorder %s1333_s28, %s1333_s28 }
  0x1d   :  { %p1340_p0 = por %p1339_p13, %p1338_p12 }
  0x1f   :  { %p1341_p1 = pnand %p1340_p0, %p1334_p11 }
  0x21   :  { %1344 = shalt.err (!%p1341_p1)
}
  0x22   :  { %39 = dma.hbm_to_vmem [thread:$0]  %s1664_s4, 1024, %s1476_s24, [#allocation3], %s1397_s15, %s1397_s15, %s1398_s16  }
  0x23   :  { %s1399_s29 = smov [#allocation7]   ;;  %s1345_s17 = scalar_lea.hbm %s1670_s10, 1024 }
  0x24   :  { %s65_s30 = sshll.u32 %s1399_s29, 4  ;;  %p1346_p2 = scmp.ne.s32.totalorder %s1670_s10, %s1345_s17  ;;  %s66_s30 = int_to_ptr.vmem [resolvable:$true] %s65_s30 }
  0x25   :  { %p1349_p3 = scmp.lt.u32.totalorder %s1345_s17, %s1670_s10 }
  0x27   :  { %p1351_p4 = pnand %p1349_p3, %p1346_p2 }
  0x29   :  { %1354 = shalt.err (!%p1351_p4)
}
  0x2a   :  { %s1355_s23 = scalar_lea.vmem %s66_s30, 1024  ;;  %p1360_p6 = scmp.lt.s32.totalorder %s66_s30, %s66_s30 }
  0x2b   :  { %p1356_p5 = scmp.ne.s32.totalorder %s66_s30, %s1355_s23  ;;  %p1361_p7 = scmp.lt.s32.totalorder %s1355_s23, %s1355_s23 }
  0x2d   :  { %p1362_p8 = por %p1361_p7, %p1360_p6 }
  0x2f   :  { %p1363_p9 = pnand %p1362_p8, %p1356_p5 }
  0x31   :  { %1366 = shalt.err (!%p1363_p9)
}
  0x32   :  { %71 = dma.hbm_to_vmem [thread:$0]  %s1670_s10, 1024, %s66_s30, [#allocation6], %s1397_s15, %s1397_s15, %s1398_s16  }
  0x33   :  { %1389 = dma.done.wait [#allocation3], 1024  }
  0x34   :  { %1390 = vsyncadd [#allocation3], 4294966272 }
  0x35   :  { %1391 = dma.done.wait [#allocation6], 4096  }
  0x36   :  { %1392 = vsyncadd [#allocation6], 4294963200  ;;  %v1400_v0 = vmov 0   ;;  %v107_v1 = vld [vmem:[%s1661_s1] sm:$0xff]  ;;  %v1251_v2 = vld [vmem:[#allocation2] sm:$0xff]   ;;  %v1401_v3 = vmov 0.0  }
  0x37   :  { %1248 = vset.pattern.permute.xlu0 %v1400_v0  ;;  %1249 = vset.pattern.permute.xlu1 %v1400_v0  ;;  %v1252_v4 = vld [vmem:[#allocation2 + $0x8] sm:$0xff]   ;;  %v1253_v5 = vld [vmem:[#allocation2 + $0x10] sm:$0xff]   ;;  %v1254_v6 = vld [vmem:[#allocation2 + $0x18] sm:$0xff]   ;;  %v1402_v24 = vmov 2102212464   ;;  %vm1408_vm9 = vmmov 0  }
  0x38   :  { %111 = vperm.xlu0 %1248, %v107_v1   ;;  %1128 = vmatprep.subr.bf16.mxu0 %v1401_v3  ;;  %v1255_v7 = vld [vmem:[#allocation2 + $0x20] sm:$0xff]   ;;  %v1256_v8 = vld [vmem:[#allocation2 + $0x28] sm:$0xff]   ;;  %v1257_v9 = vld [vmem:[#allocation2 + $0x30] sm:$0xff]   ;;  %v1403_v26 = vmov 920167782   ;;  %s1410_s16 = smov [#allocation8]  }
  0x39   :  { %1148 = vmatprep.subr.bf16.mxu1 %v1401_v3  ;;  %1129 = vmatpush3.bf16.msra.mxu0 %v1251_v2  ;;  %v1017_v10 = vld [vmem:[%s1662_s2] ss:$0 sm:$0xff]  ;;  %v1404_v30 = vmov 1326507024   ;;  %v1405_v32 = vmov 683565275  }
  0x3a   :  { %1130 = vmatprep.subr.bf16.mxu0 %v1401_v3  ;;  %v1406_v34 = vmov 2475754826   ;;  %v1407_v37 = vmov 2131351028   ;;  %1144 = vmatprep.mubr.msk.bf16.mxu0 %vm1408_vm9, %v1401_v3 }
  0x3b   :  { %1164 = vmatprep.mubr.msk.bf16.mxu1 %vm1408_vm9, %v1401_v3 }
  0x3d   :  { %1131 = vmatpush3.bf16.msra.mxu0 %v1252_v4 }
  0x3e   :  { %1132 = vmatprep.subr.bf16.mxu0 %v1401_v3 }
  0x41   :  { %1133 = vmatpush3.bf16.msra.mxu0 %v1253_v5 }
  0x42   :  { %1134 = vmatprep.subr.bf16.mxu0 %v1401_v3 }
  0x45   :  { %1135 = vmatpush3.bf16.msra.mxu0 %v1254_v6 }
  0x46   :  { %1136 = vmatprep.subr.bf16.mxu0 %v1401_v3 }
  0x49   :  { %1137 = vmatpush3.bf16.msra.mxu0 %v1255_v7 }
  0x4a   :  { %1138 = vmatprep.subr.bf16.mxu0 %v1401_v3 }
  0x4d   :  { %1139 = vmatpush3.bf16.msra.mxu0 %v1256_v8 }
  0x4e   :  { %1140 = vmatprep.subr.bf16.mxu0 %v1401_v3 }
  0x51   :  { %1141 = vmatpush3.bf16.msra.mxu0 %v1257_v9 }
  0x52   :  { %1142 = vmatprep.subr.bf16.mxu0 %v1401_v3 }
  0xb7   :  { %v112_v11 = vpop.permute.xlu0 %111 }
  0xb8   :  { %v1543_v12 = vmul.f32 %v1017_v10, %v112_v11 }
  0xba   :  { %v124_v13 = vand.u32 2139095040, %v1543_v12  ;;  %v121_v14 = vand.u32 2147483647, %v1543_v12  ;;  %vm123_vm7 = vcmp.lt.s32.totalorder %v1543_v12, 0 }
  0xbc   :  { %v125_v15 = vshrl.u32 %v124_v13, 23  ;;  %v128_v17 = vand.u32 8388607, %v121_v14  ;;  %vm122_vm8 = vcmp.le.f32.partialorder %v121_v14, 0.7853982 }
  0xbe   :  { %v1018_v16 = vadd.s32 4294967169, %v125_v15  ;;  %v129_v20 = vor.u32 8388608, %v128_v17 }
  0xc0   :  { %v131_v18 = vadd.s32 1, %v1018_v16  ;;  %v169_v28 = vshll.u32 %v129_v20, 8 }
  0xc2   :  { %vm132_vm0 = vcmp.gt.s32.totalorder %v131_v18, 0 }
  0xc3   :  { %v133_v19 = vsel %vm132_vm0, %v131_v18, 0  ;;  %vm213_vm0 = vweird.f32 %v1543_v12 }
  0xc4   :  { %v135_v21 = vand.u32 31, %v133_v19  ;;  %v134_v22 = vshrl.u32 %v133_v19, 5 }
  0xc6   :  { %v136_v23 = vsub.s32 32, %v135_v21  ;;  %v147_v25 = vshll.u32 %v1402_v24, %v135_v21  ;;  %v150_v27 = vshll.u32 %v1403_v26, %v135_v21  ;;  %v138_v33 = vshll.u32 %v1405_v32, %v135_v21 }
  0xc7   :  { %v141_v36 = vshll.u32 %v1406_v34, %v135_v21  ;;  %v144_v39 = vshll.u32 %v1407_v37, %v135_v21  ;;  %vm156_vm1 = vcmp.lt.s32.totalorder %v134_v22, 4  ;;  %vm153_vm2 = vcmp.lt.s32.totalorder %v134_v22, 1 }
  0xc8   :  { %v148_v29 = vshrl.u32 %v1403_v26, %v136_v23  ;;  %v151_v31 = vshrl.u32 %v1404_v30, %v136_v23  ;;  %v139_v35 = vshrl.u32 %v1406_v34, %v136_v23  ;;  %v142_v38 = vshrl.u32 %v1407_v37, %v136_v23  ;;  %v1258_v34 = vld [vmem:[#allocation2 + $0x38] sm:$0xff]  }
  0xc9   :  { %v145_v40 = vshrl.u32 %v1402_v24, %v136_v23  ;;  %v137_v44 = vshrl.u32 %v1405_v32, %v136_v23  ;;  %vm154_vm3 = vcmp.lt.s32.totalorder %v134_v22, 2  ;;  %vm155_vm4 = vcmp.lt.s32.totalorder %v134_v22, 3  ;;  %1143 = vmatpush3.bf16.msra.mxu0 %v1258_v34 }
  0xca   :  { %v149_v41 = vor.u32 %v148_v29, %v147_v25  ;;  %v152_v42 = vor.u32 %v151_v31, %v150_v27  ;;  %v140_v43 = vor.u32 %v139_v35, %v138_v33  ;;  %v143_v45 = vor.u32 %v142_v38, %v141_v36  ;;  %v84_v35 = vld [vmem:[%s1660_s0] sm:$0xff]  ;;  %v1259_v36 = vld [vmem:[#allocation5] sm:$0xff]   ;;  %1168 = vmatprep.subr.bf16.mxu0 %v1401_v3  ;;  %v1260_v38 = vld [vmem:[#allocation5 + $0x8] sm:$0xff]   ;;  %s1005_s0 = sshll.u32 %s1410_s16, 4  ;;  %s1006_s0 = int_to_ptr.vmem [resolvable:$true] %s1005_s0 }
  0xcb   :  { %v146_v46 = vor.u32 %v145_v40, %v144_v39  ;;  %88 = vperm.xlu1 %1249, %v84_v35   ;;  %1149 = vmatpush3.bf16.msra.mxu1 %v1259_v36  ;;  %p1372_p11 = scmp.lt.s32.totalorder %s1006_s0, %s1006_s0 }
  0xcc   :  { %v162_v47 = vsel %vm156_vm1, %v149_v41, 920167782  ;;  %v166_v48 = vsel %vm156_vm1, %v152_v42, 1326507024  ;;  %v161_v50 = vsel %vm153_vm2, %v140_v43, %v143_v45  ;;  %v157_v53 = vsel %vm153_vm2, %v137_v44, %v140_v43  ;;  %1150 = vmatprep.subr.bf16.mxu1 %v1401_v3 }
  0xcd   :  { %v158_v49 = vsel %vm156_vm1, %v146_v46, 2102212464  ;;  %v163_v51 = vsel %vm155_vm4, %v146_v46, %v162_v47  ;;  %v165_v52 = vsel %vm153_vm2, %v143_v45, %v146_v46  ;;  %v167_v56 = vsel %vm155_vm4, %v149_v41, %v166_v48  ;;  %v1261_v46 = vld [vmem:[#allocation5 + $0x10] sm:$0xff]  }
  0xce   :  { %v159_v54 = vsel %vm155_vm4, %v143_v45, %v158_v49  ;;  %v164_v55 = vsel %vm154_vm3, %v161_v50, %v163_v51  ;;  %v168_v57 = vsel %vm154_vm3, %v165_v52, %v167_v56  ;;  %v1409_v43 = vmov 1  }
  0xcf   :  { %v1549_v58 = vmul.u32.u64.low %v169_v28, %v164_v55  ;;  %v1550_v59 = vmul.u32.u64.high %v169_v28, %v164_v55, %v1549_v58  ;;  %v1552_v60 = vmul.u32.u64.low %v169_v28, %v168_v57  ;;  %v1553_v61 = vmul.u32.u64.high %v169_v28, %v168_v57, %v1552_v60  ;;  %1250 = vset.pattern.permute.xlu1 %v1409_v43  ;;  %1151 = vmatpush3.bf16.msra.mxu1 %v1260_v38  ;;  %v1264_v55 = vld [vmem:[#allocation5 + $0x28] sm:$0xff]   ;;  %v1044_v38 = vld [vmem:[%s1668_s8] ss:$0 sm:$0xff] }
  0xd0   :  { %v160_v62 = vsel %vm154_vm3, %v157_v53, %v159_v54  ;;  %98 = vperm.xlu1 %1250, %v84_v35   ;;  %1152 = vmatprep.subr.bf16.mxu1 %v1401_v3  ;;  %v1262_v53 = vld [vmem:[#allocation5 + $0x18] sm:$0xff]   ;;  %v1263_v54 = vld [vmem:[#allocation5 + $0x20] sm:$0xff]   ;;  %vm332_vm1 = vcmask 523264  }
  0xd1   :  { %v179_v63 = vadd.s32 1, %v1550_v59  ;;  %v176_v0 = vmul.u32 %v169_v28, %v160_v62  ;;  %vm178_vm5 = vc.u32 %v1553_v61, %v1549_v58  ;;  %v177_v15 = vadd.s32 %v1549_v58, %v1553_v61  ;;  %v1265_v58 = vld [vmem:[#allocation5 + $0x30] sm:$0xff]  }
  0xd2   :  { %v1015_v61 = vld [vmem:[%s1663_s3] ss:$0 sm:$0xff]  ;;  %v1016_v62 = vld [vmem:[%s1663_s3 + $0x1] ss:$0 sm:$0xff] }
  0xd3   :  { %v180_v1 = vsel %vm178_vm5, %v179_v63, %v1550_v59  ;;  %1153 = vmatpush3.bf16.msra.mxu1 %v1261_v46  ;;  %v1266_v59 = vld [vmem:[#allocation5 + $0x38] sm:$0xff]  }
  0xd4   :  { %v181_v2 = vadd.s32 %v180_v1, %v176_v0  ;;  %1154 = vmatprep.subr.bf16.mxu1 %v1401_v3 }
  0xd6   :  { %v182_v4 = vadd.s32 536870912, %v181_v2 }
  0xd7   :  { %1155 = vmatpush3.bf16.msra.mxu1 %v1262_v53  ;;  %v1276_v53 = vld [vmem:[#allocation5 + $0x88] sm:$0xff]  }
  0xd8   :  { %v183_v5 = vshrl.u32 %v182_v4, 30  ;;  %1156 = vmatprep.subr.bf16.mxu1 %v1401_v3 }
  0xda   :  { %v184_v6 = vshll.u32 %v183_v5, 30  ;;  %v207_v27 = vsub.s32 4, %v183_v5 }
  0xdb   :  { %1157 = vmatpush3.bf16.msra.mxu1 %v1263_v54  ;;  %v1277_v54 = vld [vmem:[#allocation5 + $0x90] sm:$0xff]  }
  0xdc   :  { %v185_v7 = vsub.s32 %v181_v2, %v184_v6  ;;  %v208_v30 = vsel %vm123_vm7, %v207_v27, %v183_v5  ;;  %1158 = vmatprep.subr.bf16.mxu1 %v1401_v3  ;;  %v1034_v5 = vld [vmem:[%s1665_s5] ss:$0 sm:$0xff] }
  0xdd   :  { %v210_v32 = vsel %vm122_vm8, 0, %v208_v30  ;;  %v1273_v27 = vld [vmem:[#allocation5 + $0x70] sm:$0xff]  }
  0xde   :  { %v187_v8 = vsub.s32 0, %v185_v7  ;;  %v214_v33 = vadd.s32 3, %v210_v32  ;;  %v318_v37 = vand.u32 3, %v210_v32 }
  0xdf   :  { %1159 = vmatpush3.bf16.msra.mxu1 %v1264_v55  ;;  %v1278_v55 = vld [vmem:[#allocation5 + $0x98] sm:$0xff]  }
  0xe0   :  { %v1019_v9 = vmin.u32 %v187_v8, %v185_v7  ;;  %v215_v14 = vand.u32 3, %v214_v33  ;;  %vm323_vm11 = vcmp.eq.s32.totalorder %v318_v37, 2  ;;  %vm320_vm13 = vcmp.eq.s32.totalorder %v318_v37, 0  ;;  %1160 = vmatprep.subr.bf16.mxu1 %v1401_v3 }
  0xe1   :  { %vm319_vm15 = vcmp.lt.s32.totalorder %v318_v37, 2 }
  0xe2   :  { %v189_v10 = vclz %v1019_v9  ;;  %vm220_vm10 = vcmp.eq.s32.totalorder %v215_v14, 2  ;;  %vm217_vm12 = vcmp.eq.s32.totalorder %v215_v14, 0  ;;  %vm216_vm14 = vcmp.lt.s32.totalorder %v215_v14, 2 }
  0xe3   :  { %1161 = vmatpush3.bf16.msra.mxu1 %v1265_v58  ;;  %v1282_v58 = vld [vmem:[#allocation5 + $0xb8] sm:$0xff]  }
  0xe4   :  { %v1020_v11 = vadd.s32 4294967294, %v189_v10  ;;  %1162 = vmatprep.subr.bf16.mxu1 %v1401_v3 }
  0xe6   :  { %vm1021_vm6 = vcmp.lt.s32.totalorder %v1020_v11, 0 }
  0xe7   :  { %v192_v13 = vsel %vm1021_vm6, 0, %v1020_v11  ;;  %1163 = vmatpush3.bf16.msra.mxu1 %v1266_v59 }
  0xe8   :  { %v193_v16 = vsub.s32 32, %v192_v13  ;;  %v197_v17 = vsub.s32 4294967266, %v192_v13  ;;  %v194_v18 = vshll.u32 %v185_v7, %v192_v13  ;;  %1188 = vmatprep.subr.bf16.mxu1 %v1401_v3  ;;  %v1035_v13 = vld [vmem:[%s1667_s7] ss:$0 sm:$0xff] }
  0xea   :  { %v195_v19 = vshrl.u32 %v177_v15, %v193_v16  ;;  %v198_v20 = vadd.s32 127, %v197_v17 }
  0xec   :  { %v196_v21 = vor.u32 %v195_v19, %v194_v18  ;;  %v199_v22 = vshll.u32 %v198_v20, 23 }
  0xee   :  { %v200_v23 = vor.u32 4788187, %v199_v22  ;;  %v203_v25 = vcvt.s32.f32 %v196_v21  ;;  %v1267_v21 = vld [vmem:[#allocation5 + $0x40] sm:$0xff]   ;;  %v1268_v22 = vld [vmem:[#allocation5 + $0x48] sm:$0xff]  }
  0xf0   :  { %v201_v24 = vand.u32 2147483647, %v200_v23  ;;  %v1269_v23 = vld [vmem:[#allocation5 + $0x50] sm:$0xff]  }
  0xf2   :  { %v204_v26 = vmul.f32 %v203_v25, %v201_v24  ;;  %v1270_v24 = vld [vmem:[#allocation5 + $0x58] sm:$0xff]   ;;  %v1271_v25 = vld [vmem:[#allocation5 + $0x60] sm:$0xff]  }
  0xf4   :  { %v205_v28 = vxor.u32 2147483648, %v204_v26 }
  0xf6   :  { %v206_v29 = vsel %vm123_vm7, %v205_v28, %v204_v26  ;;  %v1272_v26 = vld [vmem:[#allocation5 + $0x68] sm:$0xff]   ;;  %v1274_v28 = vld [vmem:[#allocation5 + $0x78] sm:$0xff]  }
  0xf7   :  { %v209_v31 = vsel %vm122_vm8, %v1543_v12, %v206_v29 }
  0xf8   :  { %1291 = vcosq.f32 %v209_v31 }
  0xf9   :  { %1293 = vsinq.f32 %v209_v31 }
 0x102   :  { %v1292_v39 = vpop.eup %1291 }
 0x103   :  { %v1294_v40 = vpop.eup %1293  ;;  %v221_v41 = vxor.u32 2147483648, %v1292_v39 }
 0x104   :  { %v218_v42 = vxor.u32 2147483648, %v1294_v40 }
 0x105   :  { %v325_v44 = vsel %vm323_vm11, %v221_v41, %v1294_v40  ;;  %v222_v45 = vsel %vm220_vm10, %v221_v41, %v1294_v40  ;;  %v1045_v40 = vld [vmem:[%s1669_s9] ss:$0 sm:$0xff] }
 0x106   :  { %v322_v47 = vsel %vm320_vm13, %v1292_v39, %v218_v42  ;;  %v219_v48 = vsel %vm217_vm12, %v1292_v39, %v218_v42 }
 0x107   :  { %v326_v49 = vsel %vm319_vm15, %v322_v47, %v325_v44  ;;  %v223_v50 = vsel %vm216_vm14, %v219_v48, %v222_v45  ;;  %v1047_v45 = vld [vmem:[%s1667_s7 + $0x1] ss:$0 sm:$0xff] }
 0x108   :  { %v327_v51 = vsel %vm213_vm0, nan, %v326_v49  ;;  %v224_v52 = vsel %vm213_vm0, nan, %v223_v50 }
 0x109   :  { %329 = vrot.lane.b32.xlu0 %v327_v51, %s1397_s15 }
 0x14a   :  { %v89_v60 = vpop.permute.xlu1 %88 }
 0x14b   :  { %v95_v0 = vmul.f32 %v1015_v61, %v89_v60 }
 0x14f   :  { %v99_v63 = vpop.permute.xlu1 %98 }
 0x150   :  { %v105_v1 = vmul.f32 %v1016_v62, %v99_v63 }
 0x152   :  { %v106_v2 = vadd.f32 %v105_v1, %v95_v0 }
 0x17b   :  { %v330_v12 = vpop.permute.xlu0 %329 }
 0x17c   :  { %v333_v56 = vsel %vm332_vm1, %v224_v52, %v330_v12  ;;  %v1275_v52 = vld [vmem:[#allocation5 + $0x80] sm:$0xff]  }
 0x17d   :  { %v334_v57 = vpack.c.bf16 %v333_v56, %v333_v56  ;;  %v1279_v12 = vld [vmem:[#allocation5 + $0xa0] sm:$0xff]   ;;  %v1280_v56 = vld [vmem:[#allocation5 + $0xa8] sm:$0xff]  }
 0x17f   :  { %1145 = vmatmul.mubr.bf16.vlgmr.msra.gmra.mrb[0].mxu0 %v334_v57  ;;  %v1281_v57 = vld [vmem:[#allocation5 + $0xb0] sm:$0xff]  }
 0x180   :  { %1184 = vmatprep.mubr.msk.bf16.mxu0 %vm1408_vm9, %v1401_v3  ;;  %1169 = vmatpush3.bf16.msra.mxu0 %v1267_v21 }
 0x181   :  { %1170 = vmatprep.subr.bf16.mxu0 %v1401_v3 }
 0x184   :  { %1171 = vmatpush3.bf16.msra.mxu0 %v1268_v22  ;;  %v1283_v22 = vld [vmem:[#allocation7] sm:$0xff]  }
 0x185   :  { %1172 = vmatprep.subr.bf16.mxu0 %v1401_v3 }
 0x188   :  { %1173 = vmatpush3.bf16.msra.mxu0 %v1269_v23  ;;  %v1284_v23 = vld [vmem:[#allocation7 + $0x8] sm:$0xff]  }
 0x189   :  { %1174 = vmatprep.subr.bf16.mxu0 %v1401_v3 }
 0x18c   :  { %1175 = vmatpush3.bf16.msra.mxu0 %v1270_v24  ;;  %v1285_v24 = vld [vmem:[#allocation7 + $0x10] sm:$0xff]  }
 0x18d   :  { %1176 = vmatprep.subr.bf16.mxu0 %v1401_v3 }
 0x190   :  { %1177 = vmatpush3.bf16.msra.mxu0 %v1271_v25  ;;  %v1286_v25 = vld [vmem:[#allocation7 + $0x18] sm:$0xff]  }
 0x191   :  { %1178 = vmatprep.subr.bf16.mxu0 %v1401_v3 }
 0x194   :  { %1179 = vmatpush3.bf16.msra.mxu0 %v1272_v26  ;;  %v1287_v26 = vld [vmem:[#allocation7 + $0x20] sm:$0xff]  }
 0x195   :  { %1180 = vmatprep.subr.bf16.mxu0 %v1401_v3 }
 0x198   :  { %1181 = vmatpush3.bf16.msra.mxu0 %v1273_v27  ;;  %v1288_v27 = vld [vmem:[#allocation7 + $0x28] sm:$0xff]  }
 0x199   :  { %1182 = vmatprep.subr.bf16.mxu0 %v1401_v3 }
 0x19c   :  { %1183 = vmatpush3.bf16.msra.mxu0 %v1274_v28  ;;  %v1289_v28 = vld [vmem:[#allocation7 + $0x30] sm:$0xff]  }
 0x19d   :  { %1208 = vmatprep.subr.bf16.mxu0 %v1401_v3 }
 0x252   :  { %v433_v4 = vpop.f32.mrb[0].mxu0 }
 0x253   :  { %v439_v6 = vadd.f32 %v433_v4, %v106_v2  ;;  %v1146_v7 = vpop.f32.mrb[1].mxu0 }
 0x254   :  { %v436_v8 = vpop.f32.mrb[2].mxu0 }
 0x255   :  { %v447_v9 = vadd.f32 %v1034_v5, %v439_v6  ;;  %v1147_v10 = vpop.f32.mrb[3].mxu0  ;;  %v1057_v6 = vld [vmem:[%s1668_s8 + $0x1] ss:$0 sm:$0xff] }
 0x256   :  { %v1059_v8 = vld [vmem:[%s1669_s9 + $0x1] ss:$0 sm:$0xff] }
 0x257   :  { %v448_v11 = vpack.c.bf16 %v447_v9, %v447_v9 }
 0x259   :  { %1165 = vmatmul.mubr.bf16.vlgmr.msra.gmra.mrb[0].mxu1 %v448_v11 }
 0x25a   :  { %1204 = vmatprep.mubr.msk.bf16.mxu1 %vm1408_vm9, %v1401_v3  ;;  %1189 = vmatpush3.bf16.msra.mxu1 %v1275_v52 }
 0x25b   :  { %1190 = vmatprep.subr.bf16.mxu1 %v1401_v3 }
 0x25e   :  { %1191 = vmatpush3.bf16.msra.mxu1 %v1276_v53 }
 0x25f   :  { %1192 = vmatprep.subr.bf16.mxu1 %v1401_v3 }
 0x262   :  { %1193 = vmatpush3.bf16.msra.mxu1 %v1277_v54 }
 0x263   :  { %1194 = vmatprep.subr.bf16.mxu1 %v1401_v3 }
 0x266   :  { %1195 = vmatpush3.bf16.msra.mxu1 %v1278_v55 }
 0x267   :  { %1196 = vmatprep.subr.bf16.mxu1 %v1401_v3 }
 0x26a   :  { %1197 = vmatpush3.bf16.msra.mxu1 %v1279_v12 }
 0x26b   :  { %1198 = vmatprep.subr.bf16.mxu1 %v1401_v3 }
 0x26e   :  { %1199 = vmatpush3.bf16.msra.mxu1 %v1280_v56 }
 0x26f   :  { %1200 = vmatprep.subr.bf16.mxu1 %v1401_v3 }
 0x272   :  { %1201 = vmatpush3.bf16.msra.mxu1 %v1281_v57 }
 0x273   :  { %1202 = vmatprep.subr.bf16.mxu1 %v1401_v3 }
 0x276   :  { %1203 = vmatpush3.bf16.msra.mxu1 %v1282_v58 }
 0x32c   :  { %v554_v15 = vpop.f32.mrb[0].mxu1 }
 0x32d   :  { %v555_v16 = vadd.f32 %v1035_v13, %v554_v15  ;;  %v1166_v17 = vpop.f32.mrb[1].mxu1  ;;  %v1061_v15 = vld [vmem:[%s1667_s7 + $0x2] ss:$0 sm:$0xff] }
 0x32e   :  { %v557_v18 = vpop.f32.mrb[2].mxu1 }
 0x32f   :  { %560 = vadd.xlane.f32.xlu0 %v555_v16  ;;  %v1167_v19 = vpop.f32.mrb[3].mxu1  ;;  %v564_v20 = vmul.f32 %v555_v16, %v555_v16 }
 0x331   :  { %565 = vadd.xlane.f32.xlu1 %v564_v20 }
 0x3bc   :  { %v561_v29 = vpop.xlane.xlu0 %560 }
 0x3bd   :  { %v563_v30 = vmul.f32 0.0078125, %v561_v29  ;;  %v1290_v29 = vld [vmem:[#allocation7 + $0x38] sm:$0xff]  }
 0x3be   :  { %v566_v31 = vpop.xlane.xlu1 %565 }
 0x3bf   :  { %v568_v32 = vmul.f32 %v563_v30, %v563_v30  ;;  %v567_v33 = vmul.f32 0.0078125, %v566_v31  ;;  %v573_v14 = vsub.f32 %v555_v16, %v563_v30 }
 0x3c1   :  { %v569_v34 = vsub.f32 %v567_v33, %v568_v32 }
 0x3c3   :  { %v570_v35 = vmax.f32 %v569_v34, 0.0 }
 0x3c5   :  { %v571_v36 = vadd.f32 1e-05, %v570_v35 }
 0x3c7   :  { %1295 = vrsqrt.f32 %v571_v36 }
 0x3d1   :  { %v1296_v37 = vpop.eup %1295 }
 0x3d2   :  { %v574_v39 = vmul.f32 %v1296_v37, %v573_v14 }
 0x3d4   :  { %v582_v41 = vmul.f32 %v1044_v38, %v574_v39  ;;  %v1071_v39 = vld [vmem:[%s1668_s8 + $0x2] ss:$0 sm:$0xff]  ;;  %s1367_s8 = scalar_lea.vmem %s1006_s0, 128 }
 0x3d5   :  { %p1368_p10 = scmp.ne.s32.totalorder %s1006_s0, %s1367_s8  ;;  %p1373_p12 = scmp.lt.s32.totalorder %s1367_s8, %s1367_s8 }
 0x3d6   :  { %v590_v42 = vadd.f32 %v1045_v40, %v582_v41 }
 0x3d7   :  { %p1374_p13 = por %p1373_p12, %p1372_p11 }
 0x3d8   :  { %v591_v43 = vmax.f32 %v590_v42, 0.0 }
 0x3d9   :  { %p1375_p0 = pnand %p1374_p13, %p1368_p10 }
 0x3da   :  { %v592_v44 = vpack.c.bf16 %v591_v43, %v591_v43 }
 0x3dc   :  { %1185 = vmatmul.mubr.bf16.vlgmr.msra.gmra.mrb[4].mxu0 %v592_v44 }
 0x3dd   :  { %1224 = vmatprep.mubr.msk.bf16.mxu0 %vm1408_vm9, %v1401_v3  ;;  %1209 = vmatpush3.bf16.msra.mxu0 %v1283_v22 }
 0x3de   :  { %1210 = vmatprep.subr.bf16.mxu0 %v1401_v3 }
 0x3e1   :  { %1211 = vmatpush3.bf16.msra.mxu0 %v1284_v23 }
 0x3e2   :  { %1212 = vmatprep.subr.bf16.mxu0 %v1401_v3 }
 0x3e5   :  { %1213 = vmatpush3.bf16.msra.mxu0 %v1285_v24 }
 0x3e6   :  { %1214 = vmatprep.subr.bf16.mxu0 %v1401_v3 }
 0x3e9   :  { %1215 = vmatpush3.bf16.msra.mxu0 %v1286_v25 }
 0x3ea   :  { %1216 = vmatprep.subr.bf16.mxu0 %v1401_v3 }
 0x3ed   :  { %1217 = vmatpush3.bf16.msra.mxu0 %v1287_v26 }
 0x3ee   :  { %1218 = vmatprep.subr.bf16.mxu0 %v1401_v3 }
 0x3f1   :  { %1219 = vmatpush3.bf16.msra.mxu0 %v1288_v27 }
 0x3f2   :  { %1220 = vmatprep.subr.bf16.mxu0 %v1401_v3 }
 0x3f5   :  { %1221 = vmatpush3.bf16.msra.mxu0 %v1289_v28 }
 0x3f6   :  { %1222 = vmatprep.subr.bf16.mxu0 %v1401_v3  ;;  %v1073_v3 = vld [vmem:[%s1669_s9 + $0x2] ss:$0 sm:$0xff] }
 0x3f9   :  { %1223 = vmatpush3.bf16.msra.mxu0 %v1290_v29 }
 0x4af   :  { %v700_v46 = vpop.f32.mrb[4].mxu0 }
 0x4b0   :  { %v701_v47 = vadd.f32 %v1047_v45, %v700_v46  ;;  %v1186_v48 = vpop.f32.mrb[5].mxu0  ;;  %v1074_v45 = vld [vmem:[%s1671_s11] ss:$0 sm:$0xff] }
 0x4b1   :  { %v703_v49 = vpop.f32.mrb[6].mxu0 }
 0x4b2   :  { %706 = vadd.xlane.f32.xlu0 %v701_v47  ;;  %v1187_v50 = vpop.f32.mrb[7].mxu0  ;;  %v709_v51 = vmul.f32 %v701_v47, %v701_v47 }
 0x4b6   :  { %710 = vadd.xlane.f32.xlu0 %v709_v51 }
 0x53f   :  { %v707_v59 = vpop.xlane.xlu0 %706 }
 0x540   :  { %v708_v60 = vmul.f32 0.0078125, %v707_v59 }
 0x542   :  { %v713_v62 = vmul.f32 %v708_v60, %v708_v60  ;;  %v718_v4 = vsub.f32 %v701_v47, %v708_v60 }
 0x543   :  { %v711_v61 = vpop.xlane.xlu0 %710 }
 0x544   :  { %v712_v63 = vmul.f32 0.0078125, %v711_v61 }
 0x546   :  { %v714_v0 = vsub.f32 %v712_v63, %v713_v62 }
 0x548   :  { %v715_v1 = vmax.f32 %v714_v0, 0.0 }
 0x54a   :  { %v716_v2 = vadd.f32 1e-05, %v715_v1 }
 0x54c   :  { %1297 = vrsqrt.f32 %v716_v2 }
 0x556   :  { %v1298_v5 = vpop.eup %1297 }
 0x557   :  { %v719_v7 = vmul.f32 %v1298_v5, %v718_v4 }
 0x559   :  { %v728_v9 = vmul.f32 %v1057_v6, %v719_v7 }
 0x55b   :  { %v737_v10 = vadd.f32 %v1059_v8, %v728_v9 }
 0x55d   :  { %v738_v11 = vmax.f32 %v737_v10, 0.0 }
 0x55f   :  { %v739_v13 = vpack.c.bf16 %v738_v11, %v738_v11 }
 0x561   :  { %1205 = vmatmul.mubr.bf16.vlgmr.msra.gmra.mrb[4].mxu1 %v739_v13 }
 0x634   :  { %v847_v16 = vpop.f32.mrb[4].mxu1 }
 0x635   :  { %v848_v17 = vadd.f32 %v1061_v15, %v847_v16  ;;  %v1206_v18 = vpop.f32.mrb[5].mxu1 }
 0x636   :  { %v850_v19 = vpop.f32.mrb[6].mxu1 }
 0x637   :  { %853 = vadd.xlane.f32.xlu1 %v848_v17  ;;  %v1207_v20 = vpop.f32.mrb[7].mxu1  ;;  %v856_v21 = vmul.f32 %v848_v17, %v848_v17 }
 0x639   :  { %857 = vadd.xlane.f32.xlu0 %v856_v21 }
 0x6c4   :  { %v854_v30 = vpop.xlane.xlu1 %853 }
 0x6c5   :  { %v855_v31 = vmul.f32 0.0078125, %v854_v30 }
 0x6c6   :  { %v858_v32 = vpop.xlane.xlu0 %857 }
 0x6c7   :  { %v860_v33 = vmul.f32 %v855_v31, %v855_v31  ;;  %v859_v34 = vmul.f32 0.0078125, %v858_v32  ;;  %v865_v37 = vsub.f32 %v848_v17, %v855_v31 }
 0x6c9   :  { %v861_v35 = vsub.f32 %v859_v34, %v860_v33 }
 0x6cb   :  { %v862_v36 = vmax.f32 %v861_v35, 0.0 }
 0x6cd   :  { %v863_v14 = vadd.f32 1e-05, %v862_v36 }
 0x6cf   :  { %1299 = vrsqrt.f32 %v863_v14 }
 0x6d9   :  { %v1300_v38 = vpop.eup %1299 }
 0x6da   :  { %v866_v40 = vmul.f32 %v1300_v38, %v865_v37 }
 0x6dc   :  { %v875_v41 = vmul.f32 %v1071_v39, %v866_v40 }
 0x6de   :  { %v884_v42 = vadd.f32 %v1073_v3, %v875_v41 }
 0x6e0   :  { %v885_v43 = vmax.f32 %v884_v42, 0.0 }
 0x6e2   :  { %v886_v44 = vpack.c.bf16 %v885_v43, %v885_v43 }
 0x6e4   :  { %1225 = vmatmul.mubr.bf16.vlgmr.msra.gmra.mrb[8].mxu0 %v886_v44 }
 0x7b7   :  { %v992_v46 = vpop.f32.mrb[8].mxu0 }
 0x7b8   :  { %v993_v47 = vadd.f32 %v1074_v45, %v992_v46  ;;  %v1226_v48 = vpop.f32.mrb[9].mxu0 }
 0x7b9   :  { %v995_v49 = vpop.f32.mrb[10].mxu0 }
 0x7ba   :  { %998 = vst [vmem:[#allocation8] sm:$0xff] %v993_v47  ;;  %v1227_v50 = vpop.f32.mrb[11].mxu0 }
 0x7bb   :  { %1378 = shalt.err (!%p1375_p0)
}
 0x7bc   :  { %s1379_s11 = scalar_lea.hbm %s1672_s12, 128 }
 0x7bd   :  { %p1380_p1 = scmp.ne.s32.totalorder %s1672_s12, %s1379_s11  ;;  %p1383_p2 = scmp.lt.u32.totalorder %s1379_s11, %s1672_s12 }
 0x7bf   :  { %p1385_p3 = pnand %p1383_p2, %p1380_p1 }
 0x7c1   :  { %1388 = shalt.err (!%p1385_p3)
}
 0x7c2   :  { %1008 = dma.vmem_to_hbm [thread:$0]  %s1006_s0, 128, %s1672_s12, [#allocation4]  }
 0x7c3   :  { %1393 = dma.done.wait [#allocation4], 128  }
 0x7c4   :  { %1394 = vsyncadd [#allocation4], 4294967168 }
 0x7c5   :  { %1012 = vsyncpa [#allocation3], 1 }
 0x7c6   :  { %1013 = vsyncpa [#allocation6], 1 }
 0x7c7   :  { %1014 = vsyncpa [#allocation4], 1 }

</bundles_post_ra>
